<compile_context>
chip_gen: v5e
topology: v5e:2x2
jax: 0.10.0
libtpu: 0.0.40
codegen_flags: <defaults>
</compile_context>

<pallas_src>
import jax
import jax.numpy as jnp
import numpy as np
from jax.experimental import pallas as pl
from jax.experimental.pallas import tpu as pltpu

_LN_EPS = 1e-6


# ----------------------------------------------------------------------------
# small helpers usable inside kernels
# ----------------------------------------------------------------------------
def _layer_norm(x, g, b):
    mu = jnp.mean(x, axis=-1, keepdims=True)
    xc = x - mu
    var = jnp.mean(xc * xc, axis=-1, keepdims=True)
    return xc * jax.lax.rsqrt(var + _LN_EPS) * g + b


def _gelu(x):
    # TODO(synk): nn.GELU() is the erf-exact GELU; the tanh approximation is used
    # here (and in the reference) for guaranteed Mosaic lowering (max diff ~3e-3).
    return jax.nn.gelu(x, approximate=True)


def _mm(a, w):
    # bf16 operands, f32 accumulation (MXU fast path).
    return jnp.dot(a.astype(jnp.bfloat16), w.astype(jnp.bfloat16),
                   preferred_element_type=jnp.float32)


# ----------------------------------------------------------------------------
# Pallas kernels
# ----------------------------------------------------------------------------
def _norm_input_proj_kernel(x_ref, g_ref, b_ref, w_ref, wb_ref, xn_ref, y_ref):
    # xn = LN(x) ; y = xn @ W + b        (norm1 fused with DCNv3.input_proj)
    xn = _layer_norm(x_ref[...], g_ref[...], b_ref[...])
    xn_ref[...] = xn.astype(xn_ref.dtype)                       # bf16 out
    y_ref[...] = (_mm(xn, w_ref[...]) + wb_ref[...]).astype(y_ref.dtype)


def _make_dwconv_ln_gelu_proj_kernel(H, W):
    def kernel(xp_ref, wdw_ref, bdw_ref, g_ref, b_ref, pw_ref, pb_ref, om_ref):
        # depthwise 3x3 (stride 1, zero pad pre-applied) + LN + GELU + the fused
        # offset/mask projection, per image.  x1 never leaves VMEM.
        C = xp_ref.shape[-1]
        xp = xp_ref[0].astype(jnp.float32)                      # (H+2, W+2, C)
        acc = jnp.zeros((H, W, C), jnp.float32)
        for dx in range(3):
            # one sublane (W-axis) shift, reused across all three H offsets
            slab = xp[:, dx:dx + W, :]                          # (H+2, W, C)
            for dy in range(3):
                k = dy * 3 + dx
                acc = acc + slab[dy:dy + H] * wdw_ref[k]        # wdw_ref[k]: (1,C)
        acc = acc + bdw_ref[...]
        x1 = _gelu(_layer_norm(acc, g_ref[...], b_ref[...]))    # (H, W, C)
        x1f = x1.reshape(H * W, C)
        # single lane-dense (HW, 256) matmul: [offset | mask | zero-pad]
        om_ref[0] = (_mm(x1f, pw_ref[...]) + pb_ref[...]).astype(om_ref.dtype)
    return kernel


def _dcn_out_mlp_kernel(x_ref, y_ref, opw_ref, opb_ref, g2_ref, lb2_ref,
                        w1_ref, b1_ref, w2_ref, b2_ref, o_ref):
    # out1 = x + y @ op_w + op_b           (DCNv3.output_proj + residual)
    # out2 = out1 + fc2(GELU(fc1(LN(out1))))   -- out1 never hits HBM
    out1 = x_ref[...] + _mm(y_ref[...], opw_ref[...]) + opb_ref[...]
    xn = _layer_norm(out1, g2_ref[...], lb2_ref[...])
    h = _gelu(_mm(xn, w1_ref[...]) + b1_ref[...])
    o_ref[...] = (out1 + _mm(h, w2_ref[...]) + b2_ref[...]).astype(o_ref.dtype)


# ----------------------------------------------------------------------------
# DCNv3 deformable sampling core (plain JAX / XLA gather)
# ----------------------------------------------------------------------------
def _dcnv3_core_sampling(x, offset, mask, group, group_channels,
                         offset_scale=1.0, out_dtype=None):
    """Faithful port of dcnv3_core_pytorch for kernel 3x3, stride 1, pad 1, dil 1."""
    B, H, W, C = x.shape
    G, Dg, P = group, group_channels, 9
    xp = jnp.pad(x, ((0, 0), (1, 1), (1, 1), (0, 0)))
    Hin, Win = H + 2, W + 2

    # reference points (in the padded, normalized coordinate system), (x, y) order
    ref_x = (jnp.arange(W, dtype=jnp.float32) + 1.5) / Win
    ref_y = (jnp.arange(H, dtype=jnp.float32) + 1.5) / Hin
    ref = jnp.stack(jnp.broadcast_arrays(ref_x[None, :], ref_y[:, None]), axis=-1)  # (H,W,2)

    # 3x3 dilation taps, tap p = i*3 + j  ->  (dx, dy) = (a[i], a[j])
    a = jnp.array([-1.0, 0.0, 1.0], jnp.float32)
    tap_x = jnp.repeat(a, 3) / Win
    tap_y = jnp.tile(a, 3) / Hin
    taps = jnp.stack([tap_x, tap_y], axis=-1)                                        # (9,2)

    loc = (ref[None, :, :, None, None, :]
           + taps[None, None, None, None, :, :] * offset_scale)                      # (1,H,W,1,9,2)
    off = (offset.astype(jnp.float32).reshape(B, H, W, G, P, 2) * offset_scale
           / jnp.array([Win, Hin], jnp.float32))
    loc = loc + off                                                                  # (B,H,W,G,9,2)

    # grid_sample: bilinear, zeros padding, align_corners=False
    sx = loc[..., 0] * Win - 0.5
    sy = loc[..., 1] * Hin - 0.5
    x0 = jnp.floor(sx)
    y0 = jnp.floor(sy)
    wx1 = sx - x0
    wy1 = sy - y0
    wx0 = 1.0 - wx1
    wy0 = 1.0 - wy1

    xg = xp.reshape(B, Hin, Win, G, Dg)
    b_idx = jnp.arange(B)[:, None, None, None, None]
    g_idx = jnp.arange(G)[None, None, None, :, None]

    def _tap(yy, xx):
        valid = ((xx >= 0) & (xx <= Win - 1) & (yy >= 0) & (yy <= Hin - 1))
        xi = jnp.clip(xx, 0, Win - 1).astype(jnp.int32)
        yi = jnp.clip(yy, 0, Hin - 1).astype(jnp.int32)
        v = xg[b_idx, yi, xi, g_idx]                                                 # (B,H,W,G,9,Dg)
        return v * valid[..., None].astype(v.dtype)

    val = (_tap(y0, x0) * (wy0 * wx0)[..., None]
           + _tap(y0, x0 + 1.0) * (wy0 * wx1)[..., None]
           + _tap(y0 + 1.0, x0) * (wy1 * wx0)[..., None]
           + _tap(y0 + 1.0, x0 + 1.0) * (wy1 * wx1)[..., None])

    out = jnp.sum(val * mask.astype(jnp.float32).reshape(B, H, W, G, P, 1), axis=4)  # (B,H,W,G,Dg)
    out = out.reshape(B, H, W, C)
    if out_dtype is not None:
        out = out.astype(out_dtype)
    return out


# ----------------------------------------------------------------------------
# wrapper
# ----------------------------------------------------------------------------
def _resident_spec(arr):
    """Weight / param block that stays resident in VMEM across the whole grid."""
    zeros = (0,) * arr.ndim
    return pl.BlockSpec(arr.shape, lambda i: zeros)


def _pick_tile(T):
    # Prefer big token tiles (512/1024 sit near the HBM roofline) but keep at
    # least 4 grid steps for pipelining.
    cands = (1024, 512, 256, 128, 64, 32, 16, 8)
    for t in cands:
        if T % t == 0 and T // t >= 4:
            return t
    for t in cands:
        if T % t == 0:
            return t
    return T


def _vmem_limit_bytes():
    # v7x: 64 MiB physical -> ask ~48 MiB (leave headroom for Mosaic scratch and
    # double-buffering).  v5e/v6e: 128 MiB physical -> ~100 MiB.
    cap = 64 * 1024 * 1024
    try:
        cap = int(getattr(pltpu.get_tpu_info(), "vmem_capacity_bytes", cap))
    except Exception:
        pass
    if cap >= 128 * 1024 * 1024:
        return 100 * 1024 * 1024
    return min(48 * 1024 * 1024, (cap * 3) // 4)


def intern_image_layer_pallas(x, p, *, groups, offset_scale=1.0):
    B, H, W, C = x.shape
    G = groups
    Dg = C // G
    T = B * H * W
    tile_t = _pick_tile(T)
    n_tiles = T // tile_t
    f32 = jnp.float32
    bf16 = jnp.bfloat16

    x_tok = x.reshape(T, C)

    # params arranged for the kernels: row-vector LN params / biases, (Cin, Cout)
    # pre-transposed bf16 weight slabs (no in-kernel transposes).
    ln1_g = p['ln1_g'].reshape(1, C); ln1_b = p['ln1_b'].reshape(1, C)
    ln2_g = p['ln2_g'].reshape(1, C); ln2_b = p['ln2_b'].reshape(1, C)
    dwln_g = p['dwln_g'].reshape(1, C); dwln_b = p['dwln_b'].reshape(1, C)
    ip_w = p['ip_w'].T.astype(bf16);  ip_b = p['ip_b'].reshape(1, C)
    op_w = p['op_w'].T.astype(bf16);  op_b = p['op_b'].reshape(1, C)
    fc1_w = p['fc1_w'].T.astype(bf16); fc1_b = p['fc1_b'].reshape(1, -1)
    fc2_w = p['fc2_w'].T.astype(bf16); fc2_b = p['fc2_b'].reshape(1, -1)
    dw_w = p['dw_w'].reshape(C, 9).transpose(1, 0).reshape(9, 1, C)   # (tap, 1, C)
    dw_b = p['dw_b'].reshape(1, C)

    n_off = G * 9 * 2
    n_msk = G * 9
    n_om = n_off + n_msk
    n_om_pad = ((n_om + 127) // 128) * 128        # lane-dense padded projection width

    # concatenated (offset | mask) projection, padded to a multiple of 128 lanes
    om_w = jnp.concatenate([p['off_w'], p['m_w']], axis=0).T            # (C, n_om)
    om_w = jnp.pad(om_w, ((0, 0), (0, n_om_pad - n_om))).astype(bf16)   # (C, pad)
    om_b = jnp.concatenate([p['off_b'], p['m_b']], axis=0).reshape(1, n_om)
    om_b = jnp.pad(om_b, ((0, 0), (0, n_om_pad - n_om)))

    def tok_spec(cols):
        return pl.BlockSpec((tile_t, cols), lambda i: (i, 0))

    cparams = pltpu.CompilerParams(
        dimension_semantics=("parallel",),
        vmem_limit_bytes=_vmem_limit_bytes())

    # ---- stage A: norm1 + DCNv3.input_proj (fused, bf16 intermediates) ------
    xn1, xproj = pl.pallas_call(
        _norm_input_proj_kernel,
        grid=(n_tiles,),
        in_specs=[tok_spec(C), _resident_spec(ln1_g), _resident_spec(ln1_b),
                  _resident_spec(ip_w), _resident_spec(ip_b)],
        out_specs=[tok_spec(C), tok_spec(C)],
        out_shape=[jax.ShapeDtypeStruct((T, C), bf16),
                   jax.ShapeDtypeStruct((T, C), bf16)],
        compiler_params=cparams,
    )(x_tok, ln1_g, ln1_b, ip_w, ip_b)

    # ---- stage B: dw_conv 3x3 + LN + GELU + offset/mask projections (fused) --
    xp = jnp.pad(xn1.reshape(B, H, W, C), ((0, 0), (1, 1), (1, 1), (0, 0)))
    offmask = pl.pallas_call(
        _make_dwconv_ln_gelu_proj_kernel(H, W),
        grid=(B,),
        in_specs=[pl.BlockSpec((1, H + 2, W + 2, C), lambda b: (b, 0, 0, 0)),
                  _resident_spec(dw_w), _resident_spec(dw_b),
                  _resident_spec(dwln_g), _resident_spec(dwln_b),
                  _resident_spec(om_w), _resident_spec(om_b)],
        out_specs=pl.BlockSpec((1, H * W, n_om_pad), lambda b: (b, 0, 0)),
        out_shape=jax.ShapeDtypeStruct((B, H * W, n_om_pad), f32),
        compiler_params=cparams,
    )(xp, dw_w, dw_b, dwln_g, dwln_b, om_w, om_b)

    # ---- deformable sampling core (plain JAX / XLA) --------------------------
    # TODO(synk): data-dependent 2-D bilinear gather; no clean Pallas equivalent.
    offmask = offmask.reshape(B, H, W, n_om_pad)
    offset = offmask[..., :n_off]
    mask = jax.nn.softmax(
        offmask[..., n_off:n_om].reshape(B, H, W, G, 9), axis=-1)
    mask = mask.reshape(B, H, W, n_msk)
    y_dcn = _dcnv3_core_sampling(xproj.reshape(B, H, W, C), offset, mask,
                                 G, Dg, offset_scale, out_dtype=bf16)

    # ---- stage C: output_proj + residual + norm2 + MLP + residual (fused) ----
    out2 = pl.pallas_call(
        _dcn_out_mlp_kernel,
        grid=(n_tiles,),
        in_specs=[tok_spec(C), tok_spec(C),
                  _resident_spec(op_w), _resident_spec(op_b),
                  _resident_spec(ln2_g), _resident_spec(ln2_b),
                  _resident_spec(fc1_w), _resident_spec(fc1_b),
                  _resident_spec(fc2_w), _resident_spec(fc2_b)],
        out_specs=tok_spec(C),
        out_shape=jax.ShapeDtypeStruct((T, C), f32),
        compiler_params=cparams,
    )(x_tok, y_dcn.reshape(T, C), op_w, op_b, ln2_g, ln2_b,
      fc1_w, fc1_b, fc2_w, fc2_b)

    return out2.reshape(B, H, W, C)


# ----------------------------------------------------------------------------
# pure-JAX reference (matches the PyTorch forward, eval mode)
# ----------------------------------------------------------------------------
def intern_image_layer_ref(x, p, *, groups, offset_scale=1.0):
    B, H, W, C = x.shape
    G = groups
    Dg = C // G

    def ln(v, g, b):
        mu = v.mean(-1, keepdims=True)
        xc = v - mu
        var = (xc * xc).mean(-1, keepdims=True)
        return xc / jnp.sqrt(var + _LN_EPS) * g + b

    gelu = lambda v: jax.nn.gelu(v, approximate=True)

    # branch 1: x + DCNv3(norm1(x))
    xn1 = ln(x, p['ln1_g'], p['ln1_b'])
    xproj = xn1 @ p['ip_w'].T + p['ip_b']
    dw = jax.lax.conv_general_dilated(
        jnp.transpose(xn1, (0, 3, 1, 2)), p['dw_w'],
        window_strides=(1, 1), padding=((1, 1), (1, 1)),
        feature_group_count=C,
        dimension_numbers=('NCHW', 'OIHW', 'NCHW'))
    dw = jnp.transpose(dw, (0, 2, 3, 1)) + p['dw_b']
    x1 = gelu(ln(dw, p['dwln_g'], p['dwln_b']))
    offset = x1 @ p['off_w'].T + p['off_b']
    mlog = x1 @ p['m_w'].T + p['m_b']
    mask = jax.nn.softmax(mlog.reshape(B, H, W, G, 9), axis=-1).reshape(B, H, W, G * 9)
    ydcn = _dcnv3_core_sampling(xproj, offset, mask, G, Dg, offset_scale)
    out1 = x + (ydcn @ p['op_w'].T + p['op_b'])

    # branch 2: x + MLP(norm2(x))
    xn2 = ln(out1, p['ln2_g'], p['ln2_b'])
    h = gelu(xn2 @ p['fc1_w'].T + p['fc1_b'])
    return out1 + (h @ p['fc2_w'].T + p['fc2_b'])


# ----------------------------------------------------------------------------
if __name__ == "__main__":
    # Small shapes consistent with an InternImage stage: channels=128, groups=8
    # (group_channels=16), mlp_ratio=4, 16x16 feature map, batch 2.
    B, H, W = 2, 16, 16
    C, G = 128, 8
    hidden = int(C * 4.0)

    keys = jax.random.split(jax.random.PRNGKey(0), 21)

    def rnd(k, shape, s=0.05):
        return s * jax.random.normal(k, shape, dtype=jnp.float32)

    p = dict(
        ln1_g=1.0 + 0.1 * jax.random.normal(keys[0], (C,), jnp.float32),
        ln1_b=rnd(keys[1], (C,), 0.1),
        ip_w=rnd(keys[2], (C, C)), ip_b=rnd(keys[3], (C,), 0.02),
        dw_w=rnd(keys[4], (C, 1, 3, 3), 0.1), dw_b=rnd(keys[5], (C,), 0.02),
        dwln_g=1.0 + 0.1 * jax.random.normal(keys[6], (C,), jnp.float32),
        dwln_b=rnd(keys[7], (C,), 0.1),
        off_w=rnd(keys[8], (G * 9 * 2, C)), off_b=rnd(keys[9], (G * 9 * 2,), 0.02),
        m_w=rnd(keys[10], (G * 9, C)), m_b=rnd(keys[11], (G * 9,), 0.02),
        op_w=rnd(keys[12], (C, C)), op_b=rnd(keys[13], (C,), 0.02),
        ln2_g=1.0 + 0.1 * jax.random.normal(keys[14], (C,), jnp.float32),
        ln2_b=rnd(keys[15], (C,), 0.1),
        fc1_w=rnd(keys[16], (hidden, C)), fc1_b=rnd(keys[17], (hidden,), 0.02),
        fc2_w=rnd(keys[18], (C, hidden)), fc2_b=rnd(keys[19], (C,), 0.02),
    )

    x = jax.random.normal(keys[20], (B, H, W, C), dtype=jnp.float32)

    out = intern_image_layer_pallas(x, p, groups=G)
    out = jax.block_until_ready(out)

    ref = intern_image_layer_ref(x, p, groups=G)
    np.testing.assert_allclose(np.asarray(out), np.asarray(ref),
                               rtol=2e-2, atol=2e-2)
    print("KERNEL_OK")
</pallas_src>

<mosaic_0001>
module attributes {stable_mosaic.version = 11 : i64} {
  func.func @_norm_input_proj_kernel(%arg0: i32, %arg1: memref<128x128xf32, #tpu.memory_space<vmem>>, %arg2: memref<1x128xf32, #tpu.memory_space<vmem>>, %arg3: memref<1x128xf32, #tpu.memory_space<vmem>>, %arg4: memref<128x128xbf16, #tpu.memory_space<vmem>>, %arg5: memref<1x128xf32, #tpu.memory_space<vmem>>, %arg6: memref<128x128xbf16, #tpu.memory_space<vmem>>, %arg7: memref<128x128xbf16, #tpu.memory_space<vmem>>) attributes {dimension_semantics = [#tpu.dimension_semantics<parallel>], iteration_bounds = array<i64: 4>, scalar_prefetch = 0 : i64, scratch_operands = 0 : i64, tpu.core_type = #tpu.core_type<tc>, window_params = [{transform_indices = @transform_0, window_bounds = array<i64: 128, 128>}, {pipeline_mode = #tpu.pipeline_mode<synchronous>, transform_indices = @transform_1, window_bounds = array<i64: 1, 128>}, {pipeline_mode = #tpu.pipeline_mode<synchronous>, transform_indices = @transform_2, window_bounds = array<i64: 1, 128>}, {pipeline_mode = #tpu.pipeline_mode<synchronous>, transform_indices = @transform_3, window_bounds = array<i64: 128, 128>}, {pipeline_mode = #tpu.pipeline_mode<synchronous>, transform_indices = @transform_4, window_bounds = array<i64: 1, 128>}, {transform_indices = @transform_5, window_bounds = array<i64: 128, 128>}, {transform_indices = @transform_6, window_bounds = array<i64: 128, 128>}]} {
    %c0 = arith.constant 0 : index
    %c0_0 = arith.constant 0 : index
    %0 = vector.load %arg1[%c0, %c0_0] : memref<128x128xf32, #tpu.memory_space<vmem>>, vector<128x128xf32>
    %c0_1 = arith.constant 0 : index
    %c0_2 = arith.constant 0 : index
    %1 = vector.load %arg2[%c0_1, %c0_2] : memref<1x128xf32, #tpu.memory_space<vmem>>, vector<1x128xf32>
    %c0_3 = arith.constant 0 : index
    %c0_4 = arith.constant 0 : index
    %2 = vector.load %arg3[%c0_3, %c0_4] : memref<1x128xf32, #tpu.memory_space<vmem>>, vector<1x128xf32>
    %cst = arith.constant dense<0.000000e+00> : vector<128xf32>
    %3 = vector.multi_reduction <add>, %0, %cst [1] : vector<128x128xf32> to vector<128xf32>
    %4 = vector.shape_cast %3 : vector<128xf32> to vector<128x1xf32>
    %cst_5 = arith.constant 1.280000e+02 : f32
    %5 = vector.broadcast %cst_5 : f32 to vector<128x1xf32>
    %6 = arith.divf %4, %5 : vector<128x1xf32>
    %7 = vector.broadcast %6 : vector<128x1xf32> to vector<128x128xf32>
    %8 = arith.subf %0, %7 : vector<128x128xf32>
    %9 = arith.mulf %8, %8 : vector<128x128xf32>
    %cst_6 = arith.constant dense<0.000000e+00> : vector<128xf32>
    %10 = vector.multi_reduction <add>, %9, %cst_6 [1] : vector<128x128xf32> to vector<128xf32>
    %11 = vector.shape_cast %10 : vector<128xf32> to vector<128x1xf32>
    %cst_7 = arith.constant 1.280000e+02 : f32
    %12 = vector.broadcast %cst_7 : f32 to vector<128x1xf32>
    %13 = arith.divf %11, %12 : vector<128x1xf32>
    %cst_8 = arith.constant 9.99999997E-7 : f32
    %14 = vector.broadcast %cst_8 : f32 to vector<128x1xf32>
    %15 = arith.addf %13, %14 : vector<128x1xf32>
    %16 = math.rsqrt %15 : vector<128x1xf32>
    %17 = vector.broadcast %16 : vector<128x1xf32> to vector<128x128xf32>
    %18 = arith.mulf %8, %17 : vector<128x128xf32>
    %19 = vector.broadcast %1 : vector<1x128xf32> to vector<128x128xf32>
    %20 = arith.mulf %18, %19 : vector<128x128xf32>
    %21 = vector.broadcast %2 : vector<1x128xf32> to vector<128x128xf32>
    %22 = arith.addf %20, %21 : vector<128x128xf32>
    %23 = arith.truncf %22 : vector<128x128xf32> to vector<128x128xbf16>
    %c0_9 = arith.constant 0 : index
    %c0_10 = arith.constant 0 : index
    %24 = vector.load %arg6[%c0_9, %c0_10] : memref<128x128xbf16, #tpu.memory_space<vmem>>, vector<128x128xbf16>
    tpu.vector_store %arg6[%c0_9, %c0_10], %23 {strides = array<i32>} : memref<128x128xbf16, #tpu.memory_space<vmem>>, vector<128x128xbf16>,
    %c0_11 = arith.constant 0 : index
    %c0_12 = arith.constant 0 : index
    %25 = vector.load %arg4[%c0_11, %c0_12] : memref<128x128xbf16, #tpu.memory_space<vmem>>, vector<128x128xbf16>
    %26 = arith.truncf %22 : vector<128x128xf32> to vector<128x128xbf16>
    %cst_13 = arith.constant dense<0.000000e+00> : vector<128x128xf32>
    %27 = tpu.matmul %26, %25, %cst_13 {dimension_numbers = #tpu.dot_dimension_numbers<[1], [0], [0], [1], [0, 0, 1, 1], [], []>} : vector<128x128xbf16>, vector<128x128xbf16>, vector<128x128xf32> -> vector<128x128xf32>
    %c0_14 = arith.constant 0 : index
    %c0_15 = arith.constant 0 : index
    %28 = vector.load %arg5[%c0_14, %c0_15] : memref<1x128xf32, #tpu.memory_space<vmem>>, vector<1x128xf32>
    %29 = vector.broadcast %28 : vector<1x128xf32> to vector<128x128xf32>
    %30 = arith.addf %27, %29 : vector<128x128xf32>
    %31 = arith.truncf %30 : vector<128x128xf32> to vector<128x128xbf16>
    %c0_16 = arith.constant 0 : index
    %c0_17 = arith.constant 0 : index
    %32 = vector.load %arg7[%c0_16, %c0_17] : memref<128x128xbf16, #tpu.memory_space<vmem>>, vector<128x128xbf16>
    tpu.vector_store %arg7[%c0_16, %c0_17], %31 {strides = array<i32>} : memref<128x128xbf16, #tpu.memory_space<vmem>>, vector<128x128xbf16>,
    return
  }
  func.func @transform_0(%arg0: i32) -> (i32, i32) {
    %c0_i32 = arith.constant 0 : i32
    %c0_i32_0 = arith.constant 0 : i32
    return %arg0, %c0_i32 : i32, i32
  }
  func.func @transform_1(%arg0: i32) -> (i32, i32) {
    %c0_i32 = arith.constant 0 : i32
    %c0_i32_0 = arith.constant 0 : i32
    %c0_i32_1 = arith.constant 0 : i32
    return %c0_i32, %c0_i32_0 : i32, i32
  }
  func.func @transform_2(%arg0: i32) -> (i32, i32) {
    %c0_i32 = arith.constant 0 : i32
    %c0_i32_0 = arith.constant 0 : i32
    %c0_i32_1 = arith.constant 0 : i32
    return %c0_i32, %c0_i32_0 : i32, i32
  }
  func.func @transform_3(%arg0: i32) -> (i32, i32) {
    %c0_i32 = arith.constant 0 : i32
    %c0_i32_0 = arith.constant 0 : i32
    %c0_i32_1 = arith.constant 0 : i32
    return %c0_i32, %c0_i32_0 : i32, i32
  }
  func.func @transform_4(%arg0: i32) -> (i32, i32) {
    %c0_i32 = arith.constant 0 : i32
    %c0_i32_0 = arith.constant 0 : i32
    %c0_i32_1 = arith.constant 0 : i32
    return %c0_i32, %c0_i32_0 : i32, i32
  }
  func.func @transform_5(%arg0: i32) -> (i32, i32) {
    %c0_i32 = arith.constant 0 : i32
    %c0_i32_0 = arith.constant 0 : i32
    return %arg0, %c0_i32 : i32, i32
  }
  func.func @transform_6(%arg0: i32) -> (i32, i32) {
    %c0_i32 = arith.constant 0 : i32
    %c0_i32_0 = arith.constant 0 : i32
    return %arg0, %c0_i32 : i32, i32
  }
}

</mosaic_0001>

<bundles_post_ra>
// kernel: tpu_custom_call.1
= control target key start
LH: loop header
LB: loop body
LE: loop exit
PB: predicated region body
PF: predicated region fallthrough
CT: control target
= control target key end

     0   :  { %s2342_s0 = inlined_call_operand.hbm [shape: f32[512,128], index: 0, kind: input, shape index: {}]   ;;  %s2343_s1 = inlined_call_operand.hbm [shape: f32[1,128], index: 1, kind: input, shape index: {}]   ;;  %s2344_s2 = inlined_call_operand.vmem [shape: f32[1,128], index: 2, kind: input, shape index: {}]   ;;  %s2345_s3 = inlined_call_operand.hbm [shape: bf16[128,128], index: 3, kind: input, shape index: {}]   ;;  %s2346_s4 = inlined_call_operand.vmem [shape: f32[1,128], index: 4, kind: input, shape index: {}]   ;;  %s2347_s5 = inlined_call_operand.hbm [shape: bf16[512,128], index: 5, kind: output, shape index: {0}]   ;;  %s2348_s6 = inlined_call_operand.hbm [shape: bf16[512,128], index: 6, kind: output, shape index: {1}]  }
   0x1   :  { %2351 = sst [smem:[#allocation17_spill]] %s2343_s1 }
   0x2   :  { %2352 = sst [smem:[#allocation18_spill]] %s2345_s3 }
   0x3   :  { %12 = vsyncpa [#allocation3], 0 }
   0x4   :  { %14 = vsyncpa [#allocation3 + $0x1], 0 }
   0x5   :  { %15 = vsyncpa [#allocation6], 0 }
   0x6   :  { %16 = vsyncpa [#allocation4], 0 }
   0x7   :  { %18 = vsyncpa [#allocation4 + $0x1], 0 }
   0x8   :  { %19 = vsyncpa [#allocation10], 0 }
   0x9   :  { %21 = vsyncpa [#allocation10 + $0x1], 0  ;;  %s1629_s21 = smov 0   ;;  %s1631_s22 = smov 0  }
   0xa   :  { %s1633_s23 = smov 0   ;;  %s1635_s24 = smov 0  }
   0xb LB: > { %s1650_s25 = sadd.s32 4294967295, %s1583_s24   ;;  %s1092_s26 = sadd.s32 4294967294, %s1583_s24   ;;  %s1583_s24 = sphi %s1635_s24, %s2381_s24   ;;  %s1579_s23 = sphi %s1633_s23, %s2385_s23   ;;  %s1575_s22 = sphi %s1631_s22, %s2384_s22   ;;  %s1571_s21 = sphi %s1629_s21, %s2383_s21  }
   0xc   : > { %s1654_s27 = sadd.s32 1, %s1583_s24   ;;  %s34_s28 = sadd.s32 1, %s1579_s23 }
   0xd   : > { %2353 = sst [smem:[#allocation15_spill]] %s1654_s27  ;;  %s31_s29 = ssub.s32 %s1583_s24, %s1654_s27 }
   0xe   : > { %p41_p0 = scmp.ne.s32.totalorder %s1579_s23, %s1575_s22  ;;  %p32_p1 = scmp.eq.s32.totalorder %s31_s29, 0 }
   0xf   : > { %p42_p2 = scmp.eq.s32.totalorder %s1583_s24, 0  ;;  %p47_p3 = scmp.ne.s32.totalorder %s1575_s22, %s1571_s21 }
  0x10   : > { %p48_p4 = scmp.eq.s32.totalorder %s1650_s25, 0  ;;  %p155_p7 = scmp.eq.s32.totalorder %s1650_s25, 3 }
  0x11   : > { %s1666_s30 = scalar_select %p32_p1, %s1579_s23, %s34_s28  }
  0x12   : > { %p1668_p5 = por %p42_p2, %p41_p0  ;;  %p1674_p6 = por %p48_p4, %p47_p3 }
  0x13   : > { %2354 = sst [smem:[#allocation16_spill]] %s1666_s30  ;;  %p161_p8 = scmp.eq.s32.totalorder %s1092_s26, 3 }
  0x14   : > { %p1093_p9 = scmp.ge.s32.totalorder %s1583_s24, 1  ;;  %p194_p10 = scmp.lt.s32.totalorder %s1583_s24, 5 }
  0x15   : > { %p1681_p11 = por %p155_p7, %p41_p0  ;;  %p1685_p12 = por %p161_p8, %p47_p3 }
  0x16   : > { %p1689_p13 = pnand %p1093_p9, %p194_p10  ;;  %s2360_s1 = sld [smem:[#allocation17_spill]] }
  0x17   : > { %s1585_s15 = smov [#allocation5]   ;;  %p1309_p2 = scmp.lt.s32.totalorder %s1583_s24, 4 }
  0x18   : > { %p1289_p1 = pneg %p1689_p13  ;;  %s208_s16 = sshll.u32 %s1585_s15, 4  ;;  %s209_s16 = int_to_ptr.vmem [resolvable:$true] %s208_s16 }
  0x19   : > { %s2361_s3 = sld [smem:[#allocation18_spill]]  ;;  %p1706_p3 = pnand %p1309_p2, %p1668_p5 }
  0x1a   : > { %p1290_p0 = pnand %p1289_p1, %p48_p4  ;;  %s1586_s26 = smov [#allocation7]  }
  0x1b   : > { %s222_s28 = sshll.u32 %s1586_s26, 4  ;;  %s239_s29 = sand.u32 1, %s1579_s23   ;;  %s223_s28 = int_to_ptr.vmem [resolvable:$true] %s222_s28 }
  0x1c   : > { %s206_s14 = sshll.u32 %s2360_s1, 4  ;;  %s1587_s12 = smov 64   ;;  %s207_s14 = int_to_ptr.hbm [resolvable:$true] %s206_s14 }
  0x1d   : > { %1292 = dma.hbm_to_vmem [thread:$0]  (!%p1290_p0), %s207_s14, 16, %s209_s16, [#allocation6]  }
  0x1e   : > { %s1588_s13 = smov 4   ;;  %s1097_s15 = sshll.u32 %s239_s29, 7 }
  0x1f   : > { %s220_s19 = sshll.u32 %s2361_s3, 4  ;;  %s1146_s1 = sshll.u32 %s1583_s24, 7  ;;  %s221_s19 = int_to_ptr.hbm [resolvable:$true] %s220_s19 }
  0x20   : > { %1295 = dma.hbm_to_vmem [thread:$0]  (!%p1290_p0), %s221_s19, 1024, %s223_s28, [#allocation6], %s1587_s12, %s1587_s12, %s1588_s13  }
  0x21   : > { %s248_s18 = scalar_lea.hbm %s2342_s0, %s1146_s1  ;;  %s243_s14 = scalar_lea.vmem [#allocation2], %s1097_s15 }
  0x22   : > { %s251_s7 = sshll.u32 %s243_s14, 4  ;;  %s249_s16 = sshll.u32 %s248_s18, 4  ;;  %s252_s7 = int_to_ptr.vmem [resolvable:$true] %s251_s7  ;;  %s250_s16 = int_to_ptr.hbm [resolvable:$true] %s249_s16 }
  0x23   : > { %s240_s3 = scalar_lea.sflag [#allocation3], %s239_s29  ;;  %s1451_s27 = sshra.s32 %s250_s16, 4  ;;  %s1452_s27 = int_to_ptr.hbm [resolvable:$true] %s1451_s27 }
  0x24   : > { %s1453_s26 = scalar_lea.hbm %s1452_s27, 128  ;;  %p1455_p7 = pneg %p1706_p3 }
  0x25   : > { %p1454_p5 = scmp.ne.s32.totalorder %s1452_s27, %s1453_s26  ;;  %s1458_s12 = scalar_lea.hbm %s2342_s0, 512 }
  0x26   : > { %p1459_p10 = scmp.lt.s32.totalorder %s1452_s27, %s2342_s0  ;;  %p1460_p1 = scmp.lt.s32.totalorder %s1458_s12, %s1453_s26 }
  0x27   : > { %p1456_p8 = pnand %p1455_p7, %p1454_p5 }
  0x28   : > { %p1461_p0 = por %p1460_p1, %p1459_p10 }
  0x29   : > { %p1457_p9 = pneg %p1456_p8 }
  0x2b   : > { %p1462_p2 = pnand %p1461_p0, %p1457_p9 }
  0x2d   : > { %1465 = shalt.err (!%p1462_p2)
}
  0x2e   : > { %s1589_s29 = smov 128   ;;  %s1590_s13 = smov 8  }
  0x2f   : > { %1299 = dma.hbm_to_vmem [thread:$0]  (!%p1706_p3), %s250_s16, 2048, %s252_s7, %s240_s3, %s1589_s29, %s1589_s29, %s1590_s13  }
  0x30   : > { %263 = sbr.rel (%p1689_p13) target bundleno = 525 (0x20d), region = 40  ;;  %s1728_s15 = sand.u32 (!%p1689_p13), 1, %s1575_s22  }
  0x31   : > { %s1101_s17 = sshll.u32 (!%p1689_p13), %s1728_s15, 7  ;;  %s266_s27 = scalar_lea.sflag (!%p1689_p13), [#allocation3], %s1728_s15 }
  0x32   : > { %s1732_s18 = scalar_lea.vmem (!%p1689_p13), [#allocation2], %s1101_s17 }
  0x35   : > { %1554 = dma.done.wait (%p1674_p6), %s266_s27, 2048  }
  0x36   : > { %1556 = vsyncadd (%p1674_p6), %s266_s27, 4294965248 }
  0x37   : > { %1558 = dma.done.wait (%p48_p4), [#allocation6], 1040  }
  0x38   : > { %1560 = vsyncadd (%p48_p4), [#allocation6], 4294966256  ;;  %v329_v0 = vld [vmem:[%s1732_s18 + $0x60] sm:$0xff]  ;;  %v330_v3 = vld [vmem:[%s1732_s18 + $0x68] sm:$0xff]  ;;  %v1591_v16 = vmov 128.0   ;;  %s1104_s11 = sshll.u32 %s1728_s15, 6 }
  0x39   : > { %v325_v1 = vld [vmem:[%s1732_s18 + $0x40] sm:$0xff]  ;;  %359 = vadd.xlane.f32.xlu1 %v329_v0  ;;  %v326_v4 = vld [vmem:[%s1732_s18 + $0x48] sm:$0xff]  ;;  %v327_v8 = vld [vmem:[%s1732_s18 + $0x50] sm:$0xff]  ;;  %1357 = vrcp.f32 %v1591_v16  ;;  %s2149_s20 = scalar_lea.vmem [#allocation8], %s1104_s11  ;;  %s1155_s14 = sshll.u32 %s1650_s25, 6 }
  0x3a   : > { %v1745_v2 = vld [vmem:[%s1732_s18] sm:$0xff]  ;;  %351 = vadd.xlane.f32.xlu0 %v325_v1  ;;  %v318_v5 = vld [vmem:[%s1732_s18 + $0x8] sm:$0xff]  ;;  %v1758_v9 = vld [vmem:[%s1732_s18 + $0x58] sm:$0xff]  ;;  %s946_s26 = scalar_lea.hbm %s2347_s5, %s1155_s14  ;;  %s947_s19 = sshll.u32 %s2149_s20, 4  ;;  %s948_s19 = int_to_ptr.vmem [resolvable:$true] %s947_s19 }
  0x3b   : > { %335 = vadd.xlane.f32.xlu2 %v1745_v2  ;;  %v321_v6 = vld [vmem:[%s1732_s18 + $0x20] sm:$0xff]  ;;  %v1753_v7 = vld [vmem:[%s1732_s18 + $0x28] sm:$0xff]  ;;  %v1761_v10 = vld [vmem:[%s1732_s18 + $0x70] sm:$0xff]  ;;  %s949_s28 = sshll.u32 %s946_s26, 4  ;;  %s930_s12 = scalar_lea.sflag [#allocation4], %s1728_s15  ;;  %s950_s28 = int_to_ptr.hbm [resolvable:$true] %s949_s28 }
  0x3c   : > { %v1764_v11 = vld [vmem:[%s1732_s18 + $0x78] sm:$0xff]  ;;  %v1770_v12 = vld [vmem:[%s1732_s18 + $0x10] sm:$0xff]  ;;  %s1495_s30 = sshra.s32 %s950_s28, 4  ;;  %s1501_s17 = scalar_lea.hbm %s2347_s5, 256  ;;  %s1496_s30 = int_to_ptr.hbm [resolvable:$true] %s1495_s30 }
  0x3d   : > { %v1773_v13 = vld [vmem:[%s1732_s18 + $0x18] sm:$0xff]  ;;  %v1776_v14 = vld [vmem:[%s1732_s18 + $0x30] sm:$0xff]  ;;  %s1497_s1 = scalar_lea.hbm %s1496_s30, 64  ;;  %p1502_p3 = scmp.lt.s32.totalorder %s1496_s30, %s2347_s5 }
  0x3e   : > { %v1782_v15 = vld [vmem:[%s1732_s18 + $0x38] sm:$0xff]  ;;  %p1498_p4 = scmp.ne.s32.totalorder %s1496_s30, %s1497_s1  ;;  %p1503_p5 = scmp.lt.s32.totalorder %s1501_s17, %s1497_s1 }
  0x3f   : > { %v1358_v17 = vpop.eup %1357 }
  0x40   : > { %v368_v18 = vmul.f32 128.0, %v1358_v17  ;;  %vm372_vm0 = vweird.f32 %v1358_v17  ;;  %p1499_p6 = pnand %p1498_p4, %p1681_p11  ;;  %p1504_p7 = por %p1503_p5, %p1502_p3 }
  0x41   : > { %361 = vadd.xlane.f32.xlu1 %v330_v3 }
  0x42   : > { %353 = vadd.xlane.f32.xlu0 %v326_v4  ;;  %v369_v19 = vsub.f32 1.0, %v368_v18  ;;  %p1500_p13 = pneg %p1499_p6 }
  0x43   : > { %337 = vadd.xlane.f32.xlu2 %v318_v5 }
  0x44   : > { %v370_v20 = vmul.f32 %v1358_v17, %v369_v19  ;;  %p1505_p8 = pnand %p1504_p7, %p1500_p13 }
  0x46   : > { %v371_v21 = vadd.f32 %v1358_v17, %v370_v20 }
  0x48   : > { %v1785_v22 = vsel %vm372_vm0, %v1358_v17, %v371_v21 }
  0x49   : > { %345 = vadd.xlane.f32.xlu1 %v1753_v7 }
  0x4a   : > { %343 = vadd.xlane.f32.xlu0 %v321_v6 }
  0x4b   : > { %355 = vadd.xlane.f32.xlu2 %v327_v8 }
  0x51   : > { %363 = vadd.xlane.f32.xlu1 %v1761_v10 }
  0x52   : > { %357 = vadd.xlane.f32.xlu0 %v1758_v9 }
  0x53   : > { %365 = vadd.xlane.f32.xlu2 %v1764_v11 }
  0x59   : > { %341 = vadd.xlane.f32.xlu1 %v1773_v13 }
  0x5a   : > { %339 = vadd.xlane.f32.xlu0 %v1770_v12 }
  0x5b   : > { %347 = vadd.xlane.f32.xlu2 %v1776_v14 }
  0x62   : > { %349 = vadd.xlane.f32.xlu0 %v1782_v15 }
  0xac   : > { %v360_v23 = vpop.xlane.xlu1 %359 }
  0xad   : > { %v352_v24 = vpop.xlane.xlu0 %351  ;;  %v386_v25 = vmul.f32 %v1785_v22, %v360_v23 }
  0xae   : > { %v382_v26 = vmul.f32 %v1785_v22, %v352_v24  ;;  %v336_v27 = vpop.xlane.xlu2 %335 }
  0xaf   : > { %v1789_v28 = vsub.f32 %v329_v0, %v386_v25  ;;  %v374_v41 = vmul.f32 %v1785_v22, %v336_v27  ;;  %v1151_v27 = vld [vmem:[#allocation7 + $0x20] sm:$0xff] }
  0xb0   : > { %v1791_v29 = vsub.f32 %v325_v1, %v382_v26  ;;  %v1154_v26 = vld [vmem:[#allocation7 + $0x38] sm:$0xff] }
  0xb1   : > { %v418_v31 = vmul.f32 %v1789_v28, %v1789_v28  ;;  %v1814_v47 = vsub.f32 %v1745_v2, %v374_v41  ;;  %1252 = vmatpush.bf16.msra.mxu2 %v1154_v26  ;;  %1253 = vmatpush.bf16.msra.mxu3 %v1154_v26 }
  0xb2   : > { %v414_v30 = vmul.f32 %v1791_v29, %v1791_v29  ;;  %848 = vmatpush.bf16.msra.mxu0 %v1154_v26  ;;  %1251 = vmatpush.bf16.msra.mxu1 %v1154_v26 }
  0xb3   : > { %446 = vadd.xlane.f32.xlu0 %v418_v31  ;;  %v406_v55 = vmul.f32 %v1814_v47, %v1814_v47 }
  0xb4   : > { %438 = vadd.xlane.f32.xlu1 %v414_v30  ;;  %v362_v32 = vpop.xlane.xlu1 %361 }
  0xb5   : > { %v354_v33 = vpop.xlane.xlu0 %353  ;;  %v387_v34 = vmul.f32 %v1785_v22, %v362_v32 }
  0xb6   : > { %v383_v35 = vmul.f32 %v1785_v22, %v354_v33  ;;  %v338_v36 = vpop.xlane.xlu2 %337 }
  0xb7   : > { %v375_v37 = vmul.f32 %v1785_v22, %v338_v36  ;;  %v1800_v38 = vsub.f32 %v330_v3, %v387_v34  ;;  %v1150_v34 = vld [vmem:[#allocation7 + $0x18] sm:$0xff] }
  0xb8   : > { %v1802_v39 = vsub.f32 %v326_v4, %v383_v35 }
  0xb9   : > { %v1804_v40 = vsub.f32 %v318_v5, %v375_v37  ;;  %v419_v42 = vmul.f32 %v1800_v38, %v1800_v38  ;;  %v1149_v37 = vld [vmem:[#allocation7 + $0x10] sm:$0xff] }
  0xba   : > { %v415_v43 = vmul.f32 %v1802_v39, %v1802_v39 }
  0xbb   : > { %v407_v44 = vmul.f32 %v1804_v40, %v1804_v40 }
  0xbc   : > { %448 = vadd.xlane.f32.xlu1 %v419_v42  ;;  %440 = vadd.xlane.f32.xlu2 %v415_v43  ;;  %v346_v46 = vpop.xlane.xlu1 %345 }
  0xbd   : > { %424 = vadd.xlane.f32.xlu0 %v407_v44  ;;  %v344_v45 = vpop.xlane.xlu0 %343  ;;  %v379_v52 = vmul.f32 %v1785_v22, %v346_v46 }
  0xbe   : > { %v378_v48 = vmul.f32 %v1785_v22, %v344_v45  ;;  %v356_v49 = vpop.xlane.xlu2 %355 }
  0xbf   : > { %v384_v50 = vmul.f32 %v1785_v22, %v356_v49  ;;  %v1830_v57 = vsub.f32 %v1753_v7, %v379_v52 }
  0xc0   : > { %v1818_v51 = vsub.f32 %v321_v6, %v378_v48  ;;  %v1148_v48 = vld [vmem:[#allocation7 + $0x8] sm:$0xff] }
  0xc1   : > { %v1821_v53 = vsub.f32 %v327_v8, %v384_v50  ;;  %v411_v0 = vmul.f32 %v1830_v57, %v1830_v57 }
  0xc2   : > { %v410_v54 = vmul.f32 %v1818_v51, %v1818_v51 }
  0xc3   : > { %v416_v56 = vmul.f32 %v1821_v53, %v1821_v53 }
  0xc4   : > { %430 = vadd.xlane.f32.xlu1 %v410_v54  ;;  %422 = vadd.xlane.f32.xlu2 %v406_v55  ;;  %v364_v59 = vpop.xlane.xlu1 %363 }
  0xc5   : > { %442 = vadd.xlane.f32.xlu0 %v416_v56  ;;  %v358_v58 = vpop.xlane.xlu0 %357  ;;  %v388_v1 = vmul.f32 %v1785_v22, %v364_v59 }
  0xc6   : > { %v385_v60 = vmul.f32 %v1785_v22, %v358_v58  ;;  %v366_v61 = vpop.xlane.xlu2 %365 }
  0xc7   : > { %v389_v62 = vmul.f32 %v1785_v22, %v366_v61  ;;  %v1848_v5 = vsub.f32 %v1761_v10, %v388_v1 }
  0xc8   : > { %v1835_v63 = vsub.f32 %v1758_v9, %v385_v60  ;;  %v1147_v60 = vld [vmem:[#allocation7] sm:$0xff] }
  0xc9   : > { %v1841_v2 = vsub.f32 %v1764_v11, %v389_v62  ;;  %v420_v17 = vmul.f32 %v1848_v5, %v1848_v5 }
  0xca   : > { %v417_v3 = vmul.f32 %v1835_v63, %v1835_v63 }
  0xcb   : > { %v421_v4 = vmul.f32 %v1841_v2, %v1841_v2 }
  0xcc   : > { %444 = vadd.xlane.f32.xlu1 %v417_v3  ;;  %432 = vadd.xlane.f32.xlu2 %v411_v0  ;;  %v342_v7 = vpop.xlane.xlu1 %341 }
  0xcd   : > { %452 = vadd.xlane.f32.xlu0 %v421_v4  ;;  %v340_v6 = vpop.xlane.xlu0 %339  ;;  %v377_v18 = vmul.f32 %v1785_v22, %v342_v7 }
  0xce   : > { %v376_v8 = vmul.f32 %v1785_v22, %v340_v6  ;;  %v348_v9 = vpop.xlane.xlu2 %347 }
  0xcf   : > { %v380_v11 = vmul.f32 %v1785_v22, %v348_v9  ;;  %v1866_v21 = vsub.f32 %v1773_v13, %v377_v18  ;;  %v1153_v13 = vld [vmem:[#allocation7 + $0x30] sm:$0xff] }
  0xd0   : > { %v1853_v16 = vsub.f32 %v1770_v12, %v376_v8  ;;  %1255 = vmatpush.bf16.msra.mxu2 %v1153_v13  ;;  %1256 = vmatpush.bf16.msra.mxu3 %v1153_v13 }
  0xd1   : > { %v1859_v19 = vsub.f32 %v1776_v14, %v380_v11  ;;  %v409_v14 = vmul.f32 %v1866_v21, %v1866_v21  ;;  %849 = vmatpush.bf16.msra.mxu0 %v1153_v13  ;;  %1254 = vmatpush.bf16.msra.mxu1 %v1153_v13 }
  0xd2   : > { %v408_v10 = vmul.f32 %v1853_v16, %v1853_v16 }
  0xd3   : > { %v412_v20 = vmul.f32 %v1859_v19, %v1859_v19 }
  0xd4   : > { %426 = vadd.xlane.f32.xlu1 %v408_v10  ;;  %450 = vadd.xlane.f32.xlu2 %v420_v17 }
  0xd5   : > { %434 = vadd.xlane.f32.xlu0 %v412_v20  ;;  %v350_v12 = vpop.xlane.xlu0 %349 }
  0xd6   : > { %v381_v23 = vmul.f32 %v1785_v22, %v350_v12 }
  0xd8   : > { %v1870_v24 = vsub.f32 %v1782_v15, %v381_v23  ;;  %v1152_v15 = vld [vmem:[#allocation7 + $0x28] sm:$0xff] }
  0xd9   : > { %1258 = vmatpush.bf16.msra.mxu2 %v1152_v15  ;;  %1259 = vmatpush.bf16.msra.mxu3 %v1152_v15 }
  0xda   : > { %v413_v25 = vmul.f32 %v1870_v24, %v1870_v24  ;;  %850 = vmatpush.bf16.msra.mxu0 %v1152_v15  ;;  %1257 = vmatpush.bf16.msra.mxu1 %v1152_v15 }
  0xdc   : > { %436 = vadd.xlane.f32.xlu1 %v413_v25  ;;  %428 = vadd.xlane.f32.xlu2 %v409_v14 }
  0xdd   : > { %1261 = vmatpush.bf16.msra.mxu2 %v1151_v27  ;;  %1262 = vmatpush.bf16.msra.mxu3 %v1151_v27 }
  0xde   : > { %851 = vmatpush.bf16.msra.mxu0 %v1151_v27  ;;  %1260 = vmatpush.bf16.msra.mxu1 %v1151_v27 }
  0xe1   : > { %1264 = vmatpush.bf16.msra.mxu2 %v1150_v34  ;;  %1265 = vmatpush.bf16.msra.mxu3 %v1150_v34 }
  0xe2   : > { %852 = vmatpush.bf16.msra.mxu0 %v1150_v34  ;;  %1263 = vmatpush.bf16.msra.mxu1 %v1150_v34 }
  0xe5   : > { %1267 = vmatpush.bf16.msra.mxu2 %v1149_v37  ;;  %1268 = vmatpush.bf16.msra.mxu3 %v1149_v37 }
  0xe6   : > { %853 = vmatpush.bf16.msra.mxu0 %v1149_v37  ;;  %1266 = vmatpush.bf16.msra.mxu1 %v1149_v37 }
  0xe9   : > { %1270 = vmatpush.bf16.msra.mxu2 %v1148_v48  ;;  %1271 = vmatpush.bf16.msra.mxu3 %v1148_v48 }
  0xea   : > { %854 = vmatpush.bf16.msra.mxu0 %v1148_v48  ;;  %1269 = vmatpush.bf16.msra.mxu1 %v1148_v48 }
  0xed   : > { %1273 = vmatpush.bf16.msra.mxu2 %v1147_v60  ;;  %1274 = vmatpush.bf16.msra.mxu3 %v1147_v60 }
  0xee   : > { %855 = vmatpush.bf16.msra.mxu0 %v1147_v60  ;;  %1272 = vmatpush.bf16.msra.mxu1 %v1147_v60 }
 0x126   : > { %v447_v31 = vpop.xlane.xlu0 %446 }
 0x127   : > { %v439_v30 = vpop.xlane.xlu1 %438  ;;  %v466_v33 = vmul.f32 %v447_v31, %v1785_v22 }
 0x128   : > { %v462_v32 = vmul.f32 %v439_v30, %v1785_v22 }
 0x129   : > { %v1880_v36 = vadd.f32 1e-06, %v466_v33 }
 0x12a   : > { %v1878_v35 = vadd.f32 1e-06, %v462_v32 }
 0x12b   : > { %vm612_vm5 = vweird.f32 %v1880_v36 }
 0x12c   : > { %1359 = vrsqrt.f32 %v1878_v35  ;;  %vm572_vm3 = vweird.f32 %v1878_v35 }
 0x12d   : > { %1361 = vrsqrt.f32 %v1880_v36 }
 0x12f   : > { %v449_v41 = vpop.xlane.xlu1 %448  ;;  %v441_v42 = vpop.xlane.xlu2 %440 }
 0x130   : > { %v467_v43 = vmul.f32 %v449_v41, %v1785_v22  ;;  %v425_v44 = vpop.xlane.xlu0 %424  ;;  %v463_v45 = vmul.f32 %v441_v42, %v1785_v22 }
 0x131   : > { %v455_v46 = vmul.f32 %v425_v44, %v1785_v22 }
 0x132   : > { %v1887_v49 = vpop.eup %1359  ;;  %v1889_v50 = vadd.f32 1e-06, %v467_v43  ;;  %v1891_v52 = vadd.f32 1e-06, %v463_v45 }
 0x133   : > { %v1893_v54 = vpop.eup %1361  ;;  %v567_v55 = vmul.f32 %v1887_v49, %v1878_v35  ;;  %v1897_v56 = vadd.f32 1e-06, %v455_v46  ;;  %vm573_vm1 = vweird.f32 %v1887_v49 }
 0x134   : > { %v607_v58 = vmul.f32 %v1893_v54, %v1880_v36  ;;  %1363 = vrsqrt.f32 %v1889_v50  ;;  %vm613_vm2 = vweird.f32 %v1893_v54  ;;  %vm1936_vm4 = vmor %vm572_vm3, %vm573_vm1  ;;  %vm622_vm6 = vweird.f32 %v1889_v50 }
 0x135   : > { %v568_v59 = vmul.f32 %v1887_v49, %v567_v55  ;;  %1365 = vrsqrt.f32 %v1897_v56  ;;  %vm502_vm7 = vweird.f32 %v1897_v56  ;;  %vm1949_vm8 = vmor %vm612_vm5, %vm613_vm2  ;;  %vm582_vm9 = vweird.f32 %v1891_v52 }
 0x136   : > { %v608_v61 = vmul.f32 %v1893_v54, %v607_v58  ;;  %1367 = vrsqrt.f32 %v1891_v52 }
 0x137   : > { %v569_v62 = vmul.f32 0.5, %v568_v59  ;;  %v431_v0 = vpop.xlane.xlu1 %430  ;;  %v423_v1 = vpop.xlane.xlu2 %422  ;;  %v1967_v59 = vld [vmem:[#allocation5] ss:$0 sm:$0xff] }
 0x138   : > { %v609_v3 = vmul.f32 0.5, %v608_v61  ;;  %v458_v4 = vmul.f32 %v431_v0, %v1785_v22  ;;  %v443_v6 = vpop.xlane.xlu0 %442  ;;  %v454_v7 = vmul.f32 %v423_v1, %v1785_v22 }
 0x139   : > { %v570_v8 = vsub.f32 1.5, %v569_v62  ;;  %v464_v9 = vmul.f32 %v443_v6, %v1785_v22 }
 0x13a   : > { %v1909_v11 = vpop.eup %1363  ;;  %v610_v17 = vsub.f32 1.5, %v609_v3  ;;  %v1912_v18 = vadd.f32 1e-06, %v458_v4  ;;  %v1928_v13 = vadd.f32 1e-06, %v454_v7 }
 0x13b   : > { %v1914_v10 = vpop.eup %1365  ;;  %v571_v20 = vmul.f32 %v1887_v49, %v570_v8  ;;  %v617_v12 = vmul.f32 %v1909_v11, %v1889_v50  ;;  %v1920_v23 = vadd.f32 1e-06, %v464_v9  ;;  %vm623_vm10 = vweird.f32 %v1909_v11 }
 0x13c   : > { %v1922_v14 = vpop.eup %1367  ;;  %v611_v25 = vmul.f32 %v1893_v54, %v610_v17  ;;  %v497_v26 = vmul.f32 %v1914_v10, %v1897_v56  ;;  %1369 = vrsqrt.f32 %v1912_v18  ;;  %vm503_vm12 = vweird.f32 %v1914_v10  ;;  %vm2008_vm0 = vmor %vm622_vm6, %vm623_vm10 }
 0x13d   : > { %v618_v15 = vmul.f32 %v1909_v11, %v617_v12  ;;  %v577_v27 = vmul.f32 %v1922_v14, %v1891_v52  ;;  %v575_v32 = vsel %vm1936_vm4, %v1887_v49, %v571_v20  ;;  %1371 = vrsqrt.f32 %v1920_v23  ;;  %v2002_v12 = vld [vmem:[%s2344_s2] ss:$0 sm:$0xff]  ;;  %vm2031_vm3 = vmor %vm502_vm7, %vm503_vm12 }
 0x13e   : > { %v498_v31 = vmul.f32 %v1914_v10, %v497_v26  ;;  %v615_v41 = vsel %vm1949_vm8, %v1893_v54, %v611_v25  ;;  %1373 = vrsqrt.f32 %v1928_v13  ;;  %v654_v55 = vmul.f32 %v575_v32, %v1791_v29 }
 0x13f   : > { %v619_v34 = vmul.f32 0.5, %v618_v15  ;;  %v578_v35 = vmul.f32 %v1922_v14, %v577_v27  ;;  %v445_v36 = vpop.xlane.xlu1 %444  ;;  %v433_v37 = vpop.xlane.xlu2 %432  ;;  %v658_v60 = vmul.f32 %v615_v41, %v1789_v28  ;;  %vm583_vm11 = vweird.f32 %v1922_v14 }
 0x140   : > { %v499_v42 = vmul.f32 0.5, %v498_v31  ;;  %v453_v43 = vpop.xlane.xlu0 %452  ;;  %v465_v46 = vmul.f32 %v445_v36, %v1785_v22  ;;  %v459_v54 = vmul.f32 %v433_v37, %v1785_v22  ;;  %vm532_vm13 = vweird.f32 %v1912_v18  ;;  %vm1990_vm15 = vmor %vm582_vm9, %vm583_vm11 }
 0x141   : > { %v620_v44 = vsub.f32 1.5, %v619_v34  ;;  %v579_v45 = vmul.f32 0.5, %v578_v35  ;;  %v469_v48 = vmul.f32 %v453_v43, %v1785_v22  ;;  %vm592_vm14 = vweird.f32 %v1920_v23 }
 0x142   : > { %v1962_v49 = vpop.eup %1369  ;;  %v500_v58 = vsub.f32 1.5, %v499_v42  ;;  %v1976_v29 = vadd.f32 1e-06, %v465_v46  ;;  %v1996_v17 = vadd.f32 1e-06, %v459_v54  ;;  %v673_v20 = vmul.f32 %v1967_v59, %v654_v55 }
 0x143   : > { %v580_v61 = vsub.f32 1.5, %v579_v45  ;;  %v527_v62 = vmul.f32 %v1962_v49, %v1912_v18  ;;  %v621_v0 = vmul.f32 %v1909_v11, %v620_v44  ;;  %v1978_v1 = vpop.eup %1371  ;;  %v1983_v4 = vadd.f32 1e-06, %v469_v48 }
 0x144   : > { %v1985_v6 = vpop.eup %1373  ;;  %v501_v7 = vmul.f32 %v1914_v10, %v500_v58  ;;  %v587_v9 = vmul.f32 %v1978_v1, %v1920_v23  ;;  %v2018_v31 = vmul.f32 %v1967_v59, %v658_v60  ;;  %vm533_vm1 = vweird.f32 %v1962_v49 }
 0x145   : > { %v581_v3 = vmul.f32 %v1922_v14, %v580_v61  ;;  %v528_v28 = vmul.f32 %v1962_v49, %v527_v62  ;;  %v487_v15 = vmul.f32 %v1985_v6, %v1928_v13  ;;  %v625_v50 = vsel %vm2008_vm0, %v1909_v11, %v621_v0  ;;  %vm2055_vm4 = vmor %vm532_vm13, %vm533_vm1 }
 0x146   : > { %v588_v32 = vmul.f32 %v1978_v1, %v587_v9  ;;  %vm492_vm2 = vweird.f32 %v1928_v13  ;;  %1375 = vrsqrt.f32 %v1976_v29  ;;  %v505_v36 = vsel %vm2031_vm3, %v1914_v10, %v501_v7 }
 0x147   : > { %v585_v25 = vsel %vm1990_vm15, %v1922_v14, %v581_v3  ;;  %v529_v26 = vmul.f32 0.5, %v528_v28  ;;  %v427_v27 = vpop.xlane.xlu1 %426  ;;  %v451_v30 = vpop.xlane.xlu2 %450  ;;  %v488_v35 = vmul.f32 %v1985_v6, %v487_v15  ;;  %1377 = vrsqrt.f32 %v1983_v4 }
 0x148   : > { %v435_v14 = vpop.xlane.xlu0 %434  ;;  %v655_v34 = vmul.f32 %v585_v25, %v1802_v39  ;;  %v589_v37 = vmul.f32 0.5, %v588_v32  ;;  %1379 = vrsqrt.f32 %v1996_v17  ;;  %v2043_v56 = vadd.f32 %v2002_v12, %v673_v20 }
 0x149   : > { %v530_v11 = vsub.f32 1.5, %v529_v26  ;;  %v489_v42 = vmul.f32 0.5, %v488_v35  ;;  %v456_v39 = vmul.f32 %v427_v27, %v1785_v22  ;;  %v460_v43 = vmul.f32 %v435_v14, %v1785_v22 }
 0x14a   : > { %v2049_v44 = vmul.f32 %v625_v50, %v1800_v38  ;;  %v590_v45 = vsub.f32 1.5, %v589_v37  ;;  %vm593_vm5 = vweird.f32 %v1978_v1  ;;  %v468_v46 = vmul.f32 %v451_v30, %v1785_v22 }
 0x14b   : > { %v531_v41 = vmul.f32 %v1962_v49, %v530_v11  ;;  %v490_v55 = vsub.f32 1.5, %v489_v42  ;;  %v2064_v38 = vadd.f32 1e-06, %v456_v39  ;;  %v674_v58 = vmul.f32 %v1967_v59, %v655_v34  ;;  %vm2094_vm8 = vmor %vm592_vm14, %vm593_vm5 }
 0x14c   : > { %v2067_v54 = vpop.eup %1375  ;;  %v2070_v18 = vmul.f32 %v505_v36, %v1804_v40  ;;  %v591_v60 = vmul.f32 %v1978_v1, %v590_v45  ;;  %vm493_vm6 = vweird.f32 %v1985_v6  ;;  %v2074_v61 = vadd.f32 1e-06, %v460_v43 }
 0x14d   : > { %v535_v48 = vsel %vm2055_vm4, %v1962_v49, %v531_v41  ;;  %v2076_v62 = vpop.eup %1377  ;;  %v491_v49 = vmul.f32 %v1985_v6, %v490_v55  ;;  %v597_v0 = vmul.f32 %v2067_v54, %v1976_v29  ;;  %vm602_vm7 = vweird.f32 %v1976_v29  ;;  %vm2110_vm10 = vmor %vm492_vm2, %vm493_vm6 }
 0x14e   : > { %1381 = vrsqrt.f32 %v2064_v38  ;;  %v2083_v40 = vadd.f32 1e-06, %v468_v46  ;;  %v2085_v3 = vpop.eup %1379  ;;  %v2088_v28 = vmul.f32 %v535_v48, %v1818_v51  ;;  %v637_v8 = vmul.f32 %v2076_v62, %v1983_v4 }
 0x14f   : > { %vm642_vm9 = vweird.f32 %v1983_v4  ;;  %v708_v9 = vpack.c.bf16 %v2043_v56, %v2043_v56  ;;  %v595_v51 = vsel %vm2094_vm8, %v1978_v1, %v591_v60  ;;  %v598_v20 = vmul.f32 %v2067_v54, %v597_v0  ;;  %v437_v25 = vpop.xlane.xlu1 %436  ;;  %v429_v26 = vpop.xlane.xlu2 %428 }
 0x150   : > { %v537_v52 = vmul.f32 %v2085_v3, %v1996_v17  ;;  %vm542_vm11 = vweird.f32 %v1996_v17  ;;  %v693_v1 = vadd.f32 %v2002_v12, %v674_v58  ;;  %v495_v13 = vsel %vm2110_vm10, %v1985_v6, %v491_v49 }
 0x151   : > { %vm603_vm12 = vweird.f32 %v2067_v54  ;;  %v638_v15 = vmul.f32 %v2076_v62, %v637_v8  ;;  %1383 = vrsqrt.f32 %v2074_v61  ;;  %v599_v27 = vmul.f32 0.5, %v598_v20 }
 0x152   : > { %vm643_vm13 = vweird.f32 %v2076_v62  ;;  %v538_v30 = vmul.f32 %v2085_v3, %v537_v52  ;;  %1385 = vrsqrt.f32 %v2083_v40  ;;  %v2130_v50 = vmul.f32 %v595_v51, %v1821_v53  ;;  %vm2158_vm2 = vmor %vm602_vm7, %vm603_vm12 }
 0x153   : > { %v639_v32 = vmul.f32 0.5, %v638_v15  ;;  %v461_v14 = vmul.f32 %v437_v25, %v1785_v22  ;;  %v457_v6 = vmul.f32 %v429_v26, %v1785_v22  ;;  %v646_v34 = vmul.f32 %v495_v13, %v1814_v47  ;;  %vm644_vm3 = vmor %vm642_vm9, %vm643_vm13 }
 0x154   : > { %v2134_v33 = vpop.eup %1381  ;;  %v600_v11 = vsub.f32 1.5, %v599_v27  ;;  %v539_v35 = vmul.f32 0.5, %v538_v30  ;;  %v1180_v36 = vpack.c.bf16 %v693_v1, %v2043_v56  ;;  %vm543_vm14 = vweird.f32 %v2085_v3 }
 0x155   : > { %v640_v37 = vsub.f32 1.5, %v639_v32  ;;  %v507_v53 = vmul.f32 %v2134_v33, %v2064_v38  ;;  %vm512_vm15 = vweird.f32 %v2064_v38  ;;  %v2142_v41 = vadd.f32 1e-06, %v461_v14  ;;  %vm544_vm4 = vmor %vm542_vm11, %vm543_vm14 }
 0x156   : > { %v601_v22 = vmul.f32 %v2067_v54, %v600_v11  ;;  %v540_v42 = vsub.f32 1.5, %v539_v35  ;;  %vm513_vm0 = vweird.f32 %v2134_v33  ;;  %vm552_vm1 = vweird.f32 %v2074_v61  ;;  %1240 = vst [vmem:[%s2149_s20 + $0x20] sm:$0xff] %v1180_v36  }
 0x157   : > { %v709_v47 = vpack.c.bf16 %v693_v1, %v693_v1  ;;  %v2152_v56 = vpop.eup %1383  ;;  %v641_v43 = vmul.f32 %v2076_v62, %v640_v37  ;;  %v508_v10 = vmul.f32 %v2134_v33, %v507_v53  ;;  %1387 = vrsqrt.f32 %v2142_v41  ;;  %vm514_vm8 = vmor %vm512_vm15, %vm513_vm0 }
 0x158   : > { %v2165_v45 = vadd.f32 1e-06, %v457_v6  ;;  %v1386_v46 = vpop.eup %1385  ;;  %v605_v48 = vsel %vm2158_vm2, %v2067_v54, %v601_v22  ;;  %v541_v29 = vmul.f32 %v2085_v3, %v540_v42  ;;  %v547_v55 = vmul.f32 %v2152_v56, %v2074_v61 }
 0x159   : > { %v776_v58 = vunpack.c.l.b16 %v708_v9  ;;  %v645_v60 = vsel %vm644_vm3, %v2076_v62, %v641_v43  ;;  %v509_v49 = vmul.f32 0.5, %v508_v10  ;;  %vm553_vm5 = vweird.f32 %v2152_v56 }
 0x15a   : > { %v627_v54 = vmul.f32 %v1386_v46, %v2083_v40  ;;  %vm632_vm6 = vweird.f32 %v2083_v40  ;;  %v2186_v4 = vmul.f32 %v605_v48, %v1835_v63  ;;  %v2189_v0 = vmul.f32 %v645_v60, %v1841_v2  ;;  %vm554_vm11 = vmor %vm552_vm1, %vm553_vm5 }
 0x15b   : > { %v545_v62 = vsel %vm544_vm4, %v2085_v3, %v541_v29  ;;  %v548_v7 = vmul.f32 %v2152_v56, %v547_v55  ;;  %v510_v8 = vsub.f32 1.5, %v509_v49  ;;  %vm633_vm7 = vweird.f32 %v1386_v46 }
 0x15c   : > { %v628_v17 = vmul.f32 %v1386_v46, %v627_v54  ;;  %1389 = vrsqrt.f32 %v2165_v45  ;;  %v651_v9 = vmul.f32 %v545_v62, %v1830_v57  ;;  %v777_v23 = vunpack.c.l.b16 %v709_v47  ;;  %vm634_vm12 = vmor %vm632_vm6, %vm633_vm7 }
 0x15d   : > { %v549_v51 = vmul.f32 0.5, %v548_v7  ;;  %v678_v63 = vmul.f32 %v1967_v59, %v2049_v44  ;;  %v1388_v20 = vpop.eup %1387  ;;  %v511_v2 = vmul.f32 %v2134_v33, %v510_v8  ;;  %v696_v3 = vadd.f32 %v2002_v12, %v2018_v31 }
 0x15e   : > { %v629_v52 = vmul.f32 0.5, %v628_v17  ;;  %v665_v25 = vmul.f32 %v1967_v59, %v646_v34  ;;  %v557_v26 = vmul.f32 %v1388_v20, %v2142_v41  ;;  %vm562_vm9 = vweird.f32 %v2142_v41 }
 0x15f   : > { %v550_v57 = vsub.f32 1.5, %v549_v51  ;;  %vm563_vm10 = vweird.f32 %v1388_v20  ;;  %v788_v44 = vpack.c.b16 %v777_v23, %v776_v58  ;;  %v515_v1 = vsel %vm514_vm8, %v2134_v33, %v511_v2 }
 0x160   : > { %v630_v13 = vsub.f32 1.5, %v629_v52  ;;  %v697_v15 = vadd.f32 %v2002_v12, %v678_v63  ;;  %v712_v31 = vpack.c.bf16 %v696_v3, %v696_v3  ;;  %v2210_v27 = vmul.f32 %v515_v1, %v1853_v16  ;;  %vm564_vm15 = vmor %vm562_vm9, %vm563_vm10 }
 0x161   : > { %v551_v30 = vmul.f32 %v2152_v56, %v550_v57  ;;  %v558_v38 = vmul.f32 %v1388_v20, %v557_v26  ;;  %876 = vmatmul.bf16.vlgmr.msra.gmra.mxu2 %v788_v44  ;;  %v666_v32 = vmul.f32 %v1967_v59, %v2070_v18  ;;  %vm522_vm13 = vweird.f32 %v2165_v45 }
 0x162   : > { %v1390_v14 = vpop.eup %1389  ;;  %v631_v6 = vmul.f32 %v1386_v46, %v630_v13  ;;  %v713_v33 = vpack.c.bf16 %v697_v15, %v697_v15  ;;  %v1190_v34 = vpack.c.bf16 %v697_v15, %v696_v3  ;;  %v780_v11 = vunpack.c.l.b16 %v712_v31 }
 0x163   : > { %v555_v16 = vsel %vm554_vm11, %v2152_v56, %v551_v30  ;;  %v559_v35 = vmul.f32 0.5, %v558_v38  ;;  %v517_v36 = vmul.f32 %v1390_v14, %v2165_v45  ;;  %vm523_vm14 = vweird.f32 %v1390_v14 }
 0x164   : > { %v652_v18 = vmul.f32 %v555_v16, %v1859_v19  ;;  %v635_v61 = vsel %vm634_vm12, %v1386_v46, %v631_v6  ;;  %1242 = vst [vmem:[%s2149_s20 + $0x30] sm:$0xff] %v1190_v34   ;;  %v781_v37 = vunpack.c.l.b16 %v713_v33  ;;  %v684_v53 = vadd.f32 %v2002_v12, %v665_v25  ;;  %vm524_vm0 = vmor %vm522_vm13, %vm523_vm14 }
 0x165   : > { %v660_v22 = vmul.f32 %v635_v61, %v1848_v5  ;;  %v560_v42 = vsub.f32 1.5, %v559_v35  ;;  %v518_v47 = vmul.f32 %v1390_v14, %v517_v36  ;;  %v685_v40 = vadd.f32 %v2002_v12, %v666_v32 }
 0x166   : > { %v790_v56 = vpack.c.b16 %v781_v37, %v780_v11  ;;  %v700_v39 = vpack.c.bf16 %v684_v53, %v684_v53  ;;  %v669_v43 = vmul.f32 %v1967_v59, %v2088_v28  ;;  %v670_v10 = vmul.f32 %v1967_v59, %v651_v9 }
 0x167   : > { %v561_v19 = vmul.f32 %v1388_v20, %v560_v42  ;;  %v519_v46 = vmul.f32 0.5, %v518_v47  ;;  %v701_v48 = vpack.c.bf16 %v685_v40, %v685_v40  ;;  %v1160_v29 = vpack.c.bf16 %v685_v40, %v684_v53 }
 0x168   : > { %886 = vmatmul.bf16.vlgmr.msra.gmra.mxu3 %v790_v56  ;;  %v768_v5 = vunpack.c.l.b16 %v700_v39  ;;  %v688_v55 = vadd.f32 %v2002_v12, %v669_v43  ;;  %v689_v58 = vadd.f32 %v2002_v12, %v670_v10  ;;  %v675_v28 = vmul.f32 %v1967_v59, %v2130_v50 }
 0x169   : > { %v565_v60 = vsel %vm564_vm15, %v1388_v20, %v561_v19  ;;  %v520_v49 = vsub.f32 1.5, %v519_v46  ;;  %1161 = vst [vmem:[%s2149_s20] sm:$0xff] %v1160_v29   ;;  %v769_v54 = vunpack.c.l.b16 %v701_v48  ;;  %v676_v62 = vmul.f32 %v1967_v59, %v2186_v4 }
 0x16a   : > { %v653_v41 = vmul.f32 %v565_v60, %v1870_v24  ;;  %v704_v7 = vpack.c.bf16 %v688_v55, %v688_v55  ;;  %v705_v8 = vpack.c.bf16 %v689_v58, %v689_v58  ;;  %v1170_v17 = vpack.c.bf16 %v689_v58, %v688_v55 }
 0x16b   : > { %v521_v9 = vmul.f32 %v1390_v14, %v520_v49  ;;  %v784_v51 = vpack.c.b16 %v769_v54, %v768_v5  ;;  %v694_v23 = vadd.f32 %v2002_v12, %v675_v28  ;;  %v695_v63 = vadd.f32 %v2002_v12, %v676_v62 }
 0x16c   : > { %1238 = vst [vmem:[%s2149_s20 + $0x10] sm:$0xff] %v1170_v17   ;;  %v772_v50 = vunpack.c.l.b16 %v704_v7  ;;  %v773_v20 = vunpack.c.l.b16 %v705_v8  ;;  %v679_v4 = vmul.f32 %v1967_v59, %v660_v22  ;;  %v680_v24 = vmul.f32 %v1967_v59, %v2189_v0 }
 0x16d   : > { %v525_v2 = vsel %vm524_vm0, %v1390_v14, %v521_v9  ;;  %856 = vmatmul.bf16.vlgmr.msra.gmra.mxu0 %v784_v51  ;;  %v710_v52 = vpack.c.bf16 %v694_v23, %v694_v23  ;;  %v711_v3 = vpack.c.bf16 %v695_v63, %v695_v63  ;;  %v1185_v25 = vpack.c.bf16 %v695_v63, %v694_v23 }
 0x16e   : > { %v649_v57 = vmul.f32 %v525_v2, %v1866_v21  ;;  %v786_v26 = vpack.c.b16 %v773_v20, %v772_v50  ;;  %v698_v45 = vadd.f32 %v2002_v12, %v679_v4  ;;  %v699_v44 = vadd.f32 %v2002_v12, %v680_v24 }
 0x16f   : > { %1241 = vst [vmem:[%s2149_s20 + $0x28] sm:$0xff] %v1185_v25   ;;  %v778_v1 = vunpack.c.l.b16 %v710_v52  ;;  %v779_v13 = vunpack.c.l.b16 %v711_v3  ;;  %v667_v15 = vmul.f32 %v1967_v59, %v2210_v27  ;;  %v671_v0 = vmul.f32 %v1967_v59, %v652_v18 }
 0x170   : > { %866 = vmatmul.bf16.vlgmr.msra.gmra.mxu1 %v786_v26  ;;  %v714_v31 = vpack.c.bf16 %v698_v45, %v698_v45  ;;  %v715_v30 = vpack.c.bf16 %v699_v44, %v699_v44  ;;  %v1195_v38 = vpack.c.bf16 %v699_v44, %v698_v45  ;;  %v668_v21 = vmul.f32 %v1967_v59, %v649_v57 }
 0x171   : > { %v789_v32 = vpack.c.b16 %v779_v13, %v778_v1  ;;  %v686_v14 = vadd.f32 %v2002_v12, %v667_v15  ;;  %v672_v6 = vmul.f32 %v1967_v59, %v653_v41  ;;  %v690_v11 = vadd.f32 %v2002_v12, %v671_v0 }
 0x172   : > { %1243 = vst [vmem:[%s2149_s20 + $0x38] sm:$0xff] %v1195_v38   ;;  %v782_v33 = vunpack.c.l.b16 %v714_v31  ;;  %v783_v34 = vunpack.c.l.b16 %v715_v30  ;;  %v687_v27 = vadd.f32 %v2002_v12, %v668_v21 }
 0x173   : > { %881 = vmatmul.bf16.gmra.mxu2 %v789_v32  ;;  %v702_v16 = vpack.c.bf16 %v686_v14, %v686_v14  ;;  %v691_v35 = vadd.f32 %v2002_v12, %v672_v6  ;;  %v706_v22 = vpack.c.bf16 %v690_v11, %v690_v11 }
 0x174   : > { %v791_v36 = vpack.c.b16 %v783_v34, %v782_v33  ;;  %v703_v18 = vpack.c.bf16 %v687_v27, %v687_v27  ;;  %v1165_v61 = vpack.c.bf16 %v687_v27, %v686_v14 }
 0x175   : > { %v707_v37 = vpack.c.bf16 %v691_v35, %v691_v35  ;;  %v1175_v59 = vpack.c.bf16 %v691_v35, %v690_v11  ;;  %v770_v42 = vunpack.c.l.b16 %v702_v16  ;;  %v774_v56 = vunpack.c.l.b16 %v706_v22 }
 0x176   : > { %1237 = vst [vmem:[%s2149_s20 + $0x8] sm:$0xff] %v1165_v61   ;;  %v771_v53 = vunpack.c.l.b16 %v703_v18 }
 0x177   : > { %1239 = vst [vmem:[%s2149_s20 + $0x18] sm:$0xff] %v1175_v59   ;;  %v775_v47 = vunpack.c.l.b16 %v707_v37 }
 0x178   : > { %891 = vmatmul.bf16.gmra.mxu3 %v791_v36  ;;  %v785_v40 = vpack.c.b16 %v771_v53, %v770_v42 }
 0x179   : > { %v787_v12 = vpack.c.b16 %v775_v47, %v774_v56 }
 0x17d   : > { %861 = vmatmul.bf16.gmra.mxu0 %v785_v40 }
 0x180   : > { %871 = vmatmul.bf16.gmra.mxu1 %v787_v12 }
 0x181   : > { %1508 = shalt.err (!%p1505_p8)
}
 0x182   : > { %s1592_s3 = smov 64   ;;  %s1593_s8 = smov 4   ;;  %v1356_v43 = vld [vmem:[%s2346_s4] ss:$0 sm:$0xff] }
 0x183   : > { %1285 = dma.vmem_to_hbm [thread:$0]  (%p1681_p11), %s948_s19, 1024, %s950_s28, %s930_s12, %s1592_s3, %s1592_s3, %s1593_s8  }
 0x184   : > { %s2295_s16 = scalar_lea.vmem [#allocation9], %s1104_s11  ;;  %s963_s19 = scalar_lea.hbm %s2348_s6, %s1155_s14 }
 0x185   : > { %s964_s28 = sshll.u32 %s2295_s16, 4  ;;  %s966_s12 = sshll.u32 %s963_s19, 4  ;;  %s965_s28 = int_to_ptr.vmem [resolvable:$true] %s964_s28  ;;  %s967_s12 = int_to_ptr.hbm [resolvable:$true] %s966_s12 }
 0x186   : > { %s935_s25 = scalar_lea.sflag [#allocation10], %s1728_s15  ;;  %s1523_s14 = sshra.s32 %s967_s12, 4  ;;  %s1524_s14 = int_to_ptr.hbm [resolvable:$true] %s1523_s14 }
 0x187   : > { %s1525_s30 = scalar_lea.hbm %s1524_s14, 64  ;;  %s1529_s13 = scalar_lea.hbm %s2348_s6, 256 }
 0x188   : > { %p1526_p9 = scmp.ne.s32.totalorder %s1524_s14, %s1525_s30  ;;  %p1530_p0 = scmp.lt.s32.totalorder %s1524_s14, %s2348_s6 }
 0x189   : > { %p1531_p2 = scmp.lt.s32.totalorder %s1529_s13, %s1525_s30 }
 0x18a   : > { %p1527_p10 = pnand %p1526_p9, %p1681_p11 }
 0x18b   : > { %p1532_p4 = por %p1531_p2, %p1530_p0 }
 0x18c   : > { %p1528_p1 = pneg %p1527_p10 }
 0x18e   : > { %p1533_p6 = pnand %p1532_p4, %p1528_p1 }
 0x1e4   : > { %v877_v39 = vpop.f32.mrf.mxu2 }
 0x1e5   : > { %v878_v48 = vadd.f32 %v1356_v43, %v877_v39 }
 0x1ea   : > { %v857_v10 = vpop.f32.mrf.mxu0 }
 0x1eb   : > { %v887_v19 = vpop.f32.mrf.mxu3  ;;  %v858_v28 = vadd.f32 %v1356_v43, %v857_v10 }
 0x1ec   : > { %v879_v46 = vpop.f32.mrf.mxu2  ;;  %v888_v54 = vadd.f32 %v1356_v43, %v887_v19 }
 0x1ed   : > { %v880_v29 = vadd.f32 %v1356_v43, %v879_v46  ;;  %v867_v5 = vpop.f32.mrf.mxu1 }
 0x1ee   : > { %v868_v17 = vadd.f32 %v1356_v43, %v867_v5 }
 0x1ef   : > { %v1220_v55 = vpack.c.bf16 %v880_v29, %v878_v48 }
 0x1f1   : > { %1247 = vst [vmem:[%s2295_s16 + $0x20] sm:$0xff] %v1220_v55  }
 0x1f2   : > { %v859_v58 = vpop.f32.mrf.mxu0 }
 0x1f3   : > { %v889_v60 = vpop.f32.mrf.mxu3  ;;  %v860_v49 = vadd.f32 %v1356_v43, %v859_v58 }
 0x1f4   : > { %v890_v62 = vadd.f32 %v1356_v43, %v889_v60 }
 0x1f5   : > { %v1200_v41 = vpack.c.bf16 %v860_v49, %v858_v28  ;;  %v869_v7 = vpop.f32.mrf.mxu1 }
 0x1f6   : > { %v1230_v8 = vpack.c.bf16 %v890_v62, %v888_v54  ;;  %v882_v9 = vpop.f32.mrf.mxu2  ;;  %v870_v51 = vadd.f32 %v1356_v43, %v869_v7 }
 0x1f7   : > { %1201 = vst [vmem:[%s2295_s16] sm:$0xff] %v1200_v41   ;;  %v883_v24 = vadd.f32 %v1356_v43, %v882_v9 }
 0x1f8   : > { %1249 = vst [vmem:[%s2295_s16 + $0x30] sm:$0xff] %v1230_v8   ;;  %v1210_v23 = vpack.c.bf16 %v870_v51, %v868_v17 }
 0x1fa   : > { %1245 = vst [vmem:[%s2295_s16 + $0x10] sm:$0xff] %v1210_v23   ;;  %v862_v63 = vpop.f32.mrf.mxu0 }
 0x1fb   : > { %v892_v50 = vpop.f32.mrf.mxu3  ;;  %v863_v25 = vadd.f32 %v1356_v43, %v862_v63 }
 0x1fc   : > { %v893_v45 = vadd.f32 %v1356_v43, %v892_v50 }
 0x1fd   : > { %v872_v20 = vpop.f32.mrf.mxu1 }
 0x1fe   : > { %v884_v4 = vpop.f32.mrf.mxu2  ;;  %v873_v15 = vadd.f32 %v1356_v43, %v872_v20 }
 0x1ff   : > { %v885_v2 = vadd.f32 %v1356_v43, %v884_v4 }
 0x201   : > { %v1225_v52 = vpack.c.bf16 %v885_v2, %v883_v24 }
 0x202   : > { %v864_v3 = vpop.f32.mrf.mxu0 }
 0x203   : > { %1248 = vst [vmem:[%s2295_s16 + $0x28] sm:$0xff] %v1225_v52   ;;  %v894_v57 = vpop.f32.mrf.mxu3  ;;  %v865_v26 = vadd.f32 %v1356_v43, %v864_v3 }
 0x204   : > { %v895_v44 = vadd.f32 %v1356_v43, %v894_v57 }
 0x205   : > { %v1205_v1 = vpack.c.bf16 %v865_v26, %v863_v25  ;;  %v874_v13 = vpop.f32.mrf.mxu1 }
 0x206   : > { %v1235_v0 = vpack.c.bf16 %v895_v44, %v893_v45  ;;  %v875_v31 = vadd.f32 %v1356_v43, %v874_v13 }
 0x207   : > { %1244 = vst [vmem:[%s2295_s16 + $0x8] sm:$0xff] %v1205_v1  }
 0x208   : > { %1250 = vst [vmem:[%s2295_s16 + $0x38] sm:$0xff] %v1235_v0   ;;  %v1215_v30 = vpack.c.bf16 %v875_v31, %v873_v15 }
 0x20a   : > { %1246 = vst [vmem:[%s2295_s16 + $0x18] sm:$0xff] %v1215_v30  }
 0x20b   : > { %1536 = shalt.err (!%p1533_p6)
}
 0x20c   : > { %1286 = dma.vmem_to_hbm [thread:$0]  (%p1681_p11), %s965_s28, 1024, %s967_s12, %s935_s25, %s1592_s3, %s1592_s3, %s1593_s8  }
 0x20d PF: > { %p1312_p13 = scmp.ge.s32.totalorder %s1583_s24, 2  ;;  %s981_s15 = sand.u32 1, %s1571_s21  }
 0x20e   : > { %s982_s18 = scalar_lea.sflag [#allocation4], %s981_s15 }
 0x20f   : > { %p1301_p3 = pnand %p1312_p13, %p1685_p12 }
 0x211   : > { %p1302_p5 = pneg %p1301_p3 }
 0x213   : > { %1562 = dma.done.wait (%p1302_p5), %s982_s18, 1024  }
 0x214   : > { %1564 = vsyncadd (%p1302_p5), %s982_s18, 4294966272  ;;  %s992_s20 = scalar_lea.sflag [#allocation10], %s981_s15 }
 0x215   : > { %1566 = dma.done.wait (%p1302_p5), %s992_s20, 1024  }
 0x216   : > { %1568 = vsyncadd (%p1302_p5), %s992_s20, 4294966272  ;;  %s2381_s24 = sld [smem:[#allocation15_spill]]  ;;  %s2383_s21 = smov %s1575_s22 }
 0x217   : > { %s2382_s9 = sld [smem:[#allocation16_spill]]  ;;  %s2384_s22 = smov %s1579_s23 }
 0x21c   : > { %p24_p11 = scmp.ge.s32.totalorder %s2381_s24, 6  }
 0x21d   : > { %s2385_s23 = smov %s2382_s9 }
 0x21e   :  { %26 = sbr.rel (!%p24_p11) target bundleno = 11 (0xb), region = 110 }
 0x223   :  { %998 = vsyncpa [#allocation3], 1 }
 0x224   :  { %1000 = vsyncpa [#allocation3 + $0x1], 1 }
 0x225   :  { %1001 = vsyncpa [#allocation6], 1 }
 0x226   :  { %1002 = vsyncpa [#allocation4], 1 }
 0x227   :  { %1004 = vsyncpa [#allocation4 + $0x1], 1 }
 0x228   :  { %1005 = vsyncpa [#allocation10], 1 }
 0x229   :  { %1007 = vsyncpa [#allocation10 + $0x1], 1 }

</bundles_post_ra>
